<compile_context>
chip_gen: v7x
topology: tpu7x:2x2x1
jax: 0.10.0
libtpu: 0.0.40
codegen_flags: <defaults>
</compile_context>

<pallas_src>
import functools

import jax
import jax.numpy as jnp
from jax import lax
from jax.experimental import pallas as pl
from jax.experimental.pallas import tpu as pltpu

NEG_SLOPE = 0.01  # nn.LeakyReLU default negative_slope


def _fused_gcn_kernel(sym_ref, a_ref, x_ref, w1_ref, w2_ref, o_ref, *, n, bt):
    """Fused 2-layer GCN for one block of `bt` graphs.

    sym_ref: (1,)   int32 in SMEM: 1 if the (self-looped) A is symmetric
    a_ref:   (bt, N, N)    adjacency (bf16 0/1 or f32), no self loops yet
    x_ref:   (bt, N, Din)  node features (f32)
    w1_ref:  (Din, Dh_p)   layer-1 weight (torch weight.T, lane-padded)
    w2_ref:  (Dh_p, Do_p)  layer-2 weight (torch weight.T, lane-padded)
    o_ref:   (bt, N, Do_p)
    """
    A = a_ref[...]
    x = x_ref[...]
    W1 = w1_ref[...]
    W2 = w2_ref[...]

    # ---- degree bookkeeping WITHOUT materializing the self-looped A ----
    # A_sl = A + diag(e),  e[r] = 1{sum(A + A^T)[r] != 0} * (1 - A[r, r])
    #   =>  A_sl @ v = A @ v + e[:, None] * v   and   rowsum(A_sl) = rowsum(A) + e
    row_sum = jnp.sum(A, axis=-1, dtype=jnp.float32)            # (bt, N)
    col_sum = jnp.sum(A, axis=-2, dtype=jnp.float32)            # (bt, N)
    eye = (lax.broadcasted_iota(jnp.int32, (n, n), 0) ==
           lax.broadcasted_iota(jnp.int32, (n, n), 1))          # (N, N) bool
    diag_a = jnp.sum(jnp.where(eye[None], A, jnp.zeros((), A.dtype)),
                     axis=-1, dtype=jnp.float32)                # (bt, N)
    ind = (row_sum + col_sum != 0).astype(jnp.float32)          # rows that gain a self loop
    e = ind * (1.0 - diag_a)
    d = row_sum + e                                             # degrees of A_sl

    nz = d != 0
    d_safe = jnp.where(nz, d, jnp.float32(1.0))
    d_rsqrt = jnp.where(nz, lax.rsqrt(d_safe), jnp.float32(0.0))    # D^-1/2
    d_inv = jnp.where(nz, 1.0 / d_safe, jnp.float32(0.0))           # D^-1
    sym_f = (sym_ref[0] != 0).astype(jnp.float32)               # 0/1 blend factor
    pre = (sym_f * d_rsqrt + (1.0 - sym_f) * d_inv)[:, :, None]     # left scaling
    post = (sym_f * d_rsqrt + (1.0 - sym_f))[:, :, None]            # right scaling (sym only)
    sl = e[:, :, None]                                              # self-loop weight

    # batched matmul: contract A's last dim with v's middle dim, batch dim 0
    dn = (((2,), (1,)), ((0,), (0,)))

    def aggregate(h):
        """pre * (A_sl @ (post * h)) without building A_sl or A_norm."""
        v = post * h                                            # f32 (bt, N, D)
        agg = lax.dot_general(A, v.astype(A.dtype), dimension_numbers=dn,
                              preferred_element_type=jnp.float32)
        return pre * (agg + sl * v)

    din = x.shape[-1]
    dh = W1.shape[-1]
    dout = W2.shape[-1]

    # ---- layer 1: z = A_norm @ LeakyReLU(x @ W1) ----
    h = jnp.dot(x.reshape(bt * n, din), W1, preferred_element_type=jnp.float32)
    h = jnp.where(h >= 0, h, NEG_SLOPE * h).reshape(bt, n, dh)
    z = aggregate(h)

    # ---- layer 2 ----
    h2 = jnp.dot(z.reshape(bt * n, dh), W2, preferred_element_type=jnp.float32)
    h2 = jnp.where(h2 >= 0, h2, NEG_SLOPE * h2).reshape(bt, n, dout)
    o_ref[...] = aggregate(h2).astype(o_ref.dtype)


def _round_up(v, m):
    return ((v + m - 1) // m) * m


def _vmem_capacity_bytes():
    """Device VMEM capacity; conservative fallback if the query fails."""
    try:
        return int(pltpu.get_tpu_info().vmem_capacity_bytes)
    except Exception:
        return 64 << 20  # v7x per-TensorCore size: safe lower bound everywhere


def gcn_forward(x, A, W1, W2, *, symmetric=None, block_b=None,
                a_dtype=jnp.bfloat16):
    """GCN.forward: two GraphConvolution layers sharing the same adjacency.

    symmetric: static bool if the caller knows whether A is symmetric (self
               loops only touch the diagonal, so raw-A symmetry == self-looped
               symmetry); None falls back to a one-pass on-device check.
    a_dtype:   dtype A is streamed in.  bfloat16 is lossless for 0/1
               adjacencies; pass jnp.float32 for weighted graphs.
    """
    B, N, _ = A.shape
    Din = x.shape[-1]
    Dh = W1.shape[-1]
    Dout = W2.shape[-1]

    if symmetric is None:
        sym_flag = jnp.all(A == jnp.swapaxes(A, -1, -2)).astype(jnp.int32).reshape(1)
    else:
        sym_flag = jnp.full((1,), 1 if symmetric else 0, dtype=jnp.int32)

    # Lane-pad the feature dims: zero columns/rows keep the math identical but
    # the output stores become unmasked and MXU columns fill.
    Dh_p = _round_up(Dh, 128)
    Dout_p = _round_up(Dout, 128)
    if Dh_p != Dh:
        W1 = jnp.pad(W1, ((0, 0), (0, Dh_p - Dh)))
        W2 = jnp.pad(W2, ((0, Dh_p - Dh), (0, 0)))
    if Dout_p != Dout:
        W2 = jnp.pad(W2, ((0, 0), (0, Dout_p - Dout)))

    A_in = A.astype(a_dtype)

    # ---- graphs-per-block sizing against a device-derived VMEM budget ----
    vmem_cap = _vmem_capacity_bytes()
    # Explicit scoped-VMEM limit: above the 16/32 MiB defaults, comfortably
    # below the smallest per-TC capacity (v7x: 64 MiB/TC).
    vmem_limit = min(int(vmem_cap * 0.75), 56 << 20)
    budget = int(vmem_limit * 0.6)          # headroom for compiler scratch
    a_bytes = jnp.dtype(a_dtype).itemsize
    per_graph = (
        2 * N * N * a_bytes                 # double-buffered A tile
        + 2 * N * N * 4                     # f32-scale temporaries over A (degree/diag)
        + 2 * N * Din * 4                   # double-buffered x tile
        + 2 * N * Dout_p * 4                # double-buffered out tile
        + N * (4 * Dh_p + 3 * Dout_p) * 4   # h, post*h (+bf16), z, h2, out intermediates
    )
    fixed = 2 * (Din * Dh_p + Dh_p * Dout_p) * 4   # double-buffered weights
    max_bt = max(1, (budget - fixed) // max(per_graph, 1))
    max_bt = min(max_bt, 128)               # bound per-step batched-matmul unroll
    if block_b is not None:
        max_bt = max(1, min(max_bt, int(block_b)))
    # Largest divisor of B that fits: no batch padding, no extra HBM copy of A.
    bt = 1
    for cand in range(min(B, max_bt), 0, -1):
        if B % cand == 0:
            bt = cand
            break
    n_blocks = B // bt
    # TODO(synk): add a row-tiled two-sweep path for very large N, where even a
    # single (1, N, N) adjacency tile exceeds the per-core VMEM budget.

    kernel = functools.partial(_fused_gcn_kernel, n=N, bt=bt)
    out = pl.pallas_call(
        kernel,
        out_shape=jax.ShapeDtypeStruct((B, N, Dout_p), x.dtype),
        grid_spec=pltpu.PrefetchScalarGridSpec(
            num_scalar_prefetch=1,
            grid=(n_blocks,),
            in_specs=[
                pl.BlockSpec((bt, N, N), lambda b, sym: (b, 0, 0)),
                pl.BlockSpec((bt, N, Din), lambda b, sym: (b, 0, 0)),
                pl.BlockSpec((Din, Dh_p), lambda b, sym: (0, 0)),
                pl.BlockSpec((Dh_p, Dout_p), lambda b, sym: (0, 0)),
            ],
            out_specs=pl.BlockSpec((bt, N, Dout_p), lambda b, sym: (b, 0, 0)),
        ),
        compiler_params=pltpu.CompilerParams(
            dimension_semantics=("parallel",),
            vmem_limit_bytes=vmem_limit,
        ),
    )(sym_flag, A_in, x, W1, W2)
    return out[..., :Dout] if Dout_p != Dout else out


def _gcn_reference(x, A, W1, W2):
    """Pure-JAX reference faithful to the PyTorch module (eval mode, f32)."""
    s = jnp.sum(A + jnp.swapaxes(A, -1, -2), axis=-1)
    N = A.shape[-1]
    eye = jnp.eye(N, dtype=bool)[None]
    A_sl = jnp.where(eye & (s != 0)[:, :, None], 1.0, A)
    d = A_sl.sum(-1)
    symmetric = jnp.all(A_sl == jnp.swapaxes(A_sl, -1, -2))
    d_safe = jnp.where(d != 0, d, 1.0)
    d_s_sym = jnp.where(d != 0, d_safe ** -0.5, 0.0)
    d_s_asym = jnp.where(d != 0, 1.0 / d_safe, 0.0)
    A_sym = d_s_sym[..., None] * A_sl * d_s_sym[..., None, :]
    A_asym = d_s_asym[..., None] * A_sl
    A_norm = jnp.where(symmetric, A_sym, A_asym)

    def layer(h, W):
        h = h @ W
        h = jnp.where(h >= 0, h, NEG_SLOPE * h)
        return jnp.einsum('bij,bjd->bid', A_norm, h)

    return layer(layer(x, W1), W2)


if __name__ == "__main__":
    key = jax.random.PRNGKey(0)
    B, N = 2, 16
    input_dim, hid_dim, output_dim = 8, 32, 16

    k1, k2, k3, k4 = jax.random.split(key, 4)

    # Node features
    x = jax.random.normal(k1, (B, N, input_dim), dtype=jnp.float32)

    # Sparse-ish symmetric binary adjacency with zero diagonal
    A_rand = (jax.random.uniform(k2, (B, N, N)) > 0.7).astype(jnp.float32)
    A = jnp.maximum(A_rand, jnp.swapaxes(A_rand, -1, -2))
    A = A * (1.0 - jnp.eye(N, dtype=jnp.float32))[None]

    # Deterministic linear weights (torch nn.Linear(in, out, bias=False).weight.T)
    W1 = jax.random.uniform(k3, (input_dim, hid_dim), jnp.float32, -1.0, 1.0) / jnp.sqrt(
        jnp.float32(input_dim))
    W2 = jax.random.uniform(k4, (hid_dim, output_dim), jnp.float32, -1.0, 1.0) / jnp.sqrt(
        jnp.float32(hid_dim))

    # A is constructed symmetric, so pass the static flag (no extra pass over A).
    fwd = jax.jit(functools.partial(gcn_forward, symmetric=True))
    out = fwd(x, A, W1, W2)
    jax.block_until_ready(out)

    assert out.shape == (B, N, output_dim)
    assert bool(jnp.all(jnp.isfinite(out)))

    ref = _gcn_reference(x, A, W1, W2)
    # bf16 adjacency is exact (0/1 values); the bf16 cast of (post*h) feeding
    # the MXU costs ~3 decimal digits in the activations, hence the tolerance.
    assert bool(jnp.allclose(out, ref, rtol=2e-2, atol=2e-2))

    print("KERNEL_OK")
</pallas_src>

<mosaic_0001>
module attributes {stable_mosaic.version = 11 : i64} {
  func.func @_fused_gcn_kernel(%arg0: i32, %arg1: memref<1xi32, #tpu.memory_space<smem>>, %arg2: memref<2x16x16xbf16, #tpu.memory_space<vmem>>, %arg3: memref<2x16x8xf32, #tpu.memory_space<vmem>>, %arg4: memref<8x128xf32, #tpu.memory_space<vmem>>, %arg5: memref<128x128xf32, #tpu.memory_space<vmem>>, %arg6: memref<2x16x128xf32, #tpu.memory_space<vmem>>) attributes {dimension_semantics = [#tpu.dimension_semantics<parallel>], iteration_bounds = array<i64: 1>, scalar_prefetch = 1 : i64, scratch_operands = 0 : i64, tpu.core_type = #tpu.core_type<tc>, window_params = [{transform_indices = @transform_0, window_bounds = array<i64: 2, 16, 16>}, {transform_indices = @transform_1, window_bounds = array<i64: 2, 16, 8>}, {pipeline_mode = #tpu.pipeline_mode<synchronous>, transform_indices = @transform_2, window_bounds = array<i64: 8, 128>}, {pipeline_mode = #tpu.pipeline_mode<synchronous>, transform_indices = @transform_3, window_bounds = array<i64: 128, 128>}, {transform_indices = @transform_4, window_bounds = array<i64: 2, 16, 128>}]} {
    %c0 = arith.constant 0 : index
    %c0_0 = arith.constant 0 : index
    %c0_1 = arith.constant 0 : index
    %0 = vector.load %arg2[%c0, %c0_0, %c0_1] : memref<2x16x16xbf16, #tpu.memory_space<vmem>>, vector<2x16x16xbf16>
    %c0_2 = arith.constant 0 : index
    %c0_3 = arith.constant 0 : index
    %c0_4 = arith.constant 0 : index
    %1 = vector.load %arg3[%c0_2, %c0_3, %c0_4] : memref<2x16x8xf32, #tpu.memory_space<vmem>>, vector<2x16x8xf32>
    %c0_5 = arith.constant 0 : index
    %c0_6 = arith.constant 0 : index
    %2 = vector.load %arg4[%c0_5, %c0_6] : memref<8x128xf32, #tpu.memory_space<vmem>>, vector<8x128xf32>
    %c0_7 = arith.constant 0 : index
    %c0_8 = arith.constant 0 : index
    %3 = vector.load %arg5[%c0_7, %c0_8] : memref<128x128xf32, #tpu.memory_space<vmem>>, vector<128x128xf32>
    %4 = arith.extf %0 : vector<2x16x16xbf16> to vector<2x16x16xf32>
    %cst = arith.constant dense<0.000000e+00> : vector<2x16xf32>
    %5 = vector.multi_reduction <add>, %4, %cst [2] : vector<2x16x16xf32> to vector<2x16xf32>
    %6 = arith.extf %0 : vector<2x16x16xbf16> to vector<2x16x16xf32>
    %cst_9 = arith.constant dense<0.000000e+00> : vector<2x16xf32>
    %7 = vector.multi_reduction <add>, %6, %cst_9 [1] : vector<2x16x16xf32> to vector<2x16xf32>
    %8 = tpu.iota {dimensions = array<i32: 0>} : vector<16x16xi32>
    %9 = tpu.iota {dimensions = array<i32: 1>} : vector<16x16xi32>
    %10 = arith.cmpi eq, %8, %9 : vector<16x16xi32>
    %11 = vector.shape_cast %10 : vector<16x16xi1> to vector<1x16x16xi1>
    %cst_10 = arith.constant 0.000000e+00 : bf16
    %12 = vector.shape_cast %11 : vector<1x16x16xi1> to vector<1x16x16xi1>
    %13 = vector.broadcast %12 : vector<1x16x16xi1> to vector<2x16x16xi1>
    %14 = vector.broadcast %cst_10 : bf16 to vector<2x16x16xbf16>
    %15 = arith.select %13, %0, %14 : vector<2x16x16xi1>, vector<2x16x16xbf16>
    %16 = arith.extf %15 : vector<2x16x16xbf16> to vector<2x16x16xf32>
    %cst_11 = arith.constant dense<0.000000e+00> : vector<2x16xf32>
    %17 = vector.multi_reduction <add>, %16, %cst_11 [2] : vector<2x16x16xf32> to vector<2x16xf32>
    %18 = arith.addf %5, %7 : vector<2x16xf32>
    %cst_12 = arith.constant 0.000000e+00 : f32
    %19 = vector.broadcast %cst_12 : f32 to vector<2x16xf32>
    %20 = arith.cmpf one, %18, %19 : vector<2x16xf32>
    %21 = arith.extui %20 : vector<2x16xi1> to vector<2x16xi32>
    %22 = arith.sitofp %21 : vector<2x16xi32> to vector<2x16xf32>
    %cst_13 = arith.constant 1.000000e+00 : f32
    %23 = vector.broadcast %cst_13 : f32 to vector<2x16xf32>
    %24 = arith.subf %23, %17 : vector<2x16xf32>
    %25 = arith.mulf %22, %24 : vector<2x16xf32>
    %26 = arith.addf %5, %25 : vector<2x16xf32>
    %cst_14 = arith.constant 0.000000e+00 : f32
    %27 = vector.broadcast %cst_14 : f32 to vector<2x16xf32>
    %28 = arith.cmpf one, %26, %27 : vector<2x16xf32>
    %cst_15 = arith.constant 1.000000e+00 : f32
    %29 = vector.broadcast %cst_15 : f32 to vector<2x16xf32>
    %30 = arith.select %28, %26, %29 : vector<2x16xi1>, vector<2x16xf32>
    %31 = math.rsqrt %30 : vector<2x16xf32>
    %cst_16 = arith.constant 0.000000e+00 : f32
    %32 = vector.broadcast %cst_16 : f32 to vector<2x16xf32>
    %33 = arith.select %28, %31, %32 : vector<2x16xi1>, vector<2x16xf32>
    %cst_17 = arith.constant 1.000000e+00 : f32
    %34 = vector.broadcast %cst_17 : f32 to vector<2x16xf32>
    %35 = arith.divf %34, %30 : vector<2x16xf32>
    %cst_18 = arith.constant 0.000000e+00 : f32
    %36 = vector.broadcast %cst_18 : f32 to vector<2x16xf32>
    %37 = arith.select %28, %35, %36 : vector<2x16xi1>, vector<2x16xf32>
    %c0_19 = arith.constant 0 : index
    %38 = memref.load %arg1[%c0_19] : memref<1xi32, #tpu.memory_space<smem>>
    %c0_i32 = arith.constant 0 : i32
    %39 = arith.cmpi ne, %38, %c0_i32 : i32
    %40 = arith.extui %39 : i1 to i32
    %41 = arith.sitofp %40 : i32 to f32
    %42 = vector.broadcast %41 : f32 to vector<2x16xf32>
    %43 = arith.mulf %42, %33 : vector<2x16xf32>
    %cst_20 = arith.constant 1.000000e+00 : f32
    %44 = arith.subf %cst_20, %41 : f32
    %45 = vector.broadcast %44 : f32 to vector<2x16xf32>
    %46 = arith.mulf %45, %37 : vector<2x16xf32>
    %47 = arith.addf %43, %46 : vector<2x16xf32>
    %48 = vector.shape_cast %47 : vector<2x16xf32> to vector<2x16x1xf32>
    %49 = vector.broadcast %41 : f32 to vector<2x16xf32>
    %50 = arith.mulf %49, %33 : vector<2x16xf32>
    %cst_21 = arith.constant 1.000000e+00 : f32
    %51 = arith.subf %cst_21, %41 : f32
    %52 = vector.broadcast %51 : f32 to vector<2x16xf32>
    %53 = arith.addf %50, %52 : vector<2x16xf32>
    %54 = vector.shape_cast %53 : vector<2x16xf32> to vector<2x16x1xf32>
    %55 = vector.shape_cast %25 : vector<2x16xf32> to vector<2x16x1xf32>
    %56 = vector.shape_cast %1 : vector<2x16x8xf32> to vector<32x8xf32>
    %cst_22 = arith.constant dense<0.000000e+00> : vector<32x128xf32>
    %57 = tpu.matmul %56, %2, %cst_22 {dimension_numbers = #tpu.dot_dimension_numbers<[1], [0], [0], [1], [0, 0, 1, 1], [], []>} : vector<32x8xf32>, vector<8x128xf32>, vector<32x128xf32> -> vector<32x128xf32>
    %cst_23 = arith.constant 0.000000e+00 : f32
    %58 = vector.broadcast %cst_23 : f32 to vector<32x128xf32>
    %59 = arith.cmpf oge, %57, %58 : vector<32x128xf32>
    %cst_24 = arith.constant 0.00999999977 : f32
    %60 = vector.broadcast %cst_24 : f32 to vector<32x128xf32>
    %61 = arith.mulf %60, %57 : vector<32x128xf32>
    %62 = arith.select %59, %57, %61 : vector<32x128xi1>, vector<32x128xf32>
    %63 = vector.shape_cast %62 : vector<32x128xf32> to vector<2x16x128xf32>
    %64 = vector.broadcast %54 : vector<2x16x1xf32> to vector<2x16x128xf32>
    %65 = arith.mulf %64, %63 : vector<2x16x128xf32>
    %66 = arith.truncf %65 : vector<2x16x128xf32> to vector<2x16x128xbf16>
    %cst_25 = arith.constant dense<0.000000e+00> : vector<2x16x128xf32>
    %67 = tpu.matmul %0, %66, %cst_25 {dimension_numbers = #tpu.dot_dimension_numbers<[2], [1], [1], [2], [0, 0, 0, 1, 1, 2], [0], [0]>} : vector<2x16x16xbf16>, vector<2x16x128xbf16>, vector<2x16x128xf32> -> vector<2x16x128xf32>
    %68 = vector.broadcast %55 : vector<2x16x1xf32> to vector<2x16x128xf32>
    %69 = arith.mulf %68, %65 : vector<2x16x128xf32>
    %70 = arith.addf %67, %69 : vector<2x16x128xf32>
    %71 = vector.broadcast %48 : vector<2x16x1xf32> to vector<2x16x128xf32>
    %72 = arith.mulf %71, %70 : vector<2x16x128xf32>
    %73 = vector.shape_cast %72 : vector<2x16x128xf32> to vector<32x128xf32>
    %cst_26 = arith.constant dense<0.000000e+00> : vector<32x128xf32>
    %74 = tpu.matmul %73, %3, %cst_26 {dimension_numbers = #tpu.dot_dimension_numbers<[1], [0], [0], [1], [0, 0, 1, 1], [], []>} : vector<32x128xf32>, vector<128x128xf32>, vector<32x128xf32> -> vector<32x128xf32>
    %cst_27 = arith.constant 0.000000e+00 : f32
    %75 = vector.broadcast %cst_27 : f32 to vector<32x128xf32>
    %76 = arith.cmpf oge, %74, %75 : vector<32x128xf32>
    %cst_28 = arith.constant 0.00999999977 : f32
    %77 = vector.broadcast %cst_28 : f32 to vector<32x128xf32>
    %78 = arith.mulf %77, %74 : vector<32x128xf32>
    %79 = arith.select %76, %74, %78 : vector<32x128xi1>, vector<32x128xf32>
    %80 = vector.shape_cast %79 : vector<32x128xf32> to vector<2x16x128xf32>
    %81 = vector.broadcast %54 : vector<2x16x1xf32> to vector<2x16x128xf32>
    %82 = arith.mulf %81, %80 : vector<2x16x128xf32>
    %83 = arith.truncf %82 : vector<2x16x128xf32> to vector<2x16x128xbf16>
    %cst_29 = arith.constant dense<0.000000e+00> : vector<2x16x128xf32>
    %84 = tpu.matmul %0, %83, %cst_29 {dimension_numbers = #tpu.dot_dimension_numbers<[2], [1], [1], [2], [0, 0, 0, 1, 1, 2], [0], [0]>} : vector<2x16x16xbf16>, vector<2x16x128xbf16>, vector<2x16x128xf32> -> vector<2x16x128xf32>
    %85 = vector.broadcast %55 : vector<2x16x1xf32> to vector<2x16x128xf32>
    %86 = arith.mulf %85, %82 : vector<2x16x128xf32>
    %87 = arith.addf %84, %86 : vector<2x16x128xf32>
    %88 = vector.broadcast %48 : vector<2x16x1xf32> to vector<2x16x128xf32>
    %89 = arith.mulf %88, %87 : vector<2x16x128xf32>
    %c0_30 = arith.constant 0 : index
    %c0_31 = arith.constant 0 : index
    %c0_32 = arith.constant 0 : index
    %90 = vector.load %arg6[%c0_30, %c0_31, %c0_32] : memref<2x16x128xf32, #tpu.memory_space<vmem>>, vector<2x16x128xf32>
    tpu.vector_store %arg6[%c0_30, %c0_31, %c0_32], %89 {strides = array<i32>} : memref<2x16x128xf32, #tpu.memory_space<vmem>>, vector<2x16x128xf32>,
    return
  }
  func.func @transform_0(%arg0: i32, %arg1: memref<1xi32, #tpu.memory_space<smem>>) -> (i32, i32, i32) {
    %c0_i32 = arith.constant 0 : i32
    %c0_i32_0 = arith.constant 0 : i32
    %c0_i32_1 = arith.constant 0 : i32
    return %arg0, %c0_i32, %c0_i32_0 : i32, i32, i32
  }
  func.func @transform_1(%arg0: i32, %arg1: memref<1xi32, #tpu.memory_space<smem>>) -> (i32, i32, i32) {
    %c0_i32 = arith.constant 0 : i32
    %c0_i32_0 = arith.constant 0 : i32
    %c0_i32_1 = arith.constant 0 : i32
    return %arg0, %c0_i32, %c0_i32_0 : i32, i32, i32
  }
  func.func @transform_2(%arg0: i32, %arg1: memref<1xi32, #tpu.memory_space<smem>>) -> (i32, i32) {
    %c0_i32 = arith.constant 0 : i32
    %c0_i32_0 = arith.constant 0 : i32
    %c0_i32_1 = arith.constant 0 : i32
    return %c0_i32, %c0_i32_0 : i32, i32
  }
  func.func @transform_3(%arg0: i32, %arg1: memref<1xi32, #tpu.memory_space<smem>>) -> (i32, i32) {
    %c0_i32 = arith.constant 0 : i32
    %c0_i32_0 = arith.constant 0 : i32
    %c0_i32_1 = arith.constant 0 : i32
    return %c0_i32, %c0_i32_0 : i32, i32
  }
  func.func @transform_4(%arg0: i32, %arg1: memref<1xi32, #tpu.memory_space<smem>>) -> (i32, i32, i32) {
    %c0_i32 = arith.constant 0 : i32
    %c0_i32_0 = arith.constant 0 : i32
    %c0_i32_1 = arith.constant 0 : i32
    return %arg0, %c0_i32, %c0_i32_0 : i32, i32, i32
  }
}

</mosaic_0001>

<bundles_post_ra>
// kernel: gcn_forward.1
= control target key start
LH: loop header
LB: loop body
LE: loop exit
PB: predicated region body
PF: predicated region fallthrough
CT: control target
= control target key end

     0   :  { %vm50_vm0 = vcmask 130048   ;;  %v77_v2 = vlaneseq  ;;  %vm209_vm1 = vcmask 64512   ;;  %s1129_s0 = inlined_call_operand.<no memory space> [shape: s32[1], index: 0, kind: input, shape index: {}]   ;;  %s1130_s1 = inlined_call_operand.vmem [shape: bf16[2,16,16], index: 1, kind: input, shape index: {}]   ;;  %s1131_s2 = inlined_call_operand.vmem [shape: f32[2,16,8], index: 2, kind: input, shape index: {}]   ;;  %s1132_s3 = inlined_call_operand.vmem [shape: f32[8,128], index: 3, kind: input, shape index: {}]   ;;  %s1133_s4 = inlined_call_operand.vmem [shape: f32[128,128], index: 4, kind: input, shape index: {}]   ;;  %s1134_s5 = inlined_call_operand.hbm [shape: f32[2,16,128], index: 5, kind: output, shape index: {}]  }
   0x1   :  { %v21_v0 = vld [vmem:[%s1130_s1] sm:$0xf]  ;;  %v24_v1 = vld [vmem:[%s1130_s1 + $0xc] sm:$0xf]  ;;  %v22_v6 = vld [vmem:[%s1130_s1 + $0x4] sm:$0xf] }
   0x2   :  { %v29_v3 = vld [vmem:[%s1132_s3] sm:$0xff]  ;;  %v46_v4 = vunpack.c.l.bf16 %v21_v0  ;;  %v49_v5 = vunpack.c.l.bf16 %v24_v1  ;;  %v47_v8 = vunpack.c.l.bf16 %v22_v6  ;;  %v954_v9 = vcombine.low %v21_v0, %v22_v6  ;;  %v23_v12 = vld [vmem:[%s1130_s1 + $0x8] sm:$0xf]  ;;  %v27_v14 = vld [vmem:[%s1131_s2 + $0x10] sm:$0xff] }
   0x3   :  { %751 = vmatprep.subr.mxu0 %v29_v3  ;;  %v25_v7 = vld [vmem:[%s1131_s2] sm:$0xff]  ;;  %v78_v10 = vshrl.u32 %v77_v2, 7  ;;  %v81_v11 = vand.u32 127, %v77_v2  ;;  %v26_v13 = vld [vmem:[%s1131_s2 + $0x8] sm:$0xff]  ;;  %v968_v17 = vcombine.low %v23_v12, %v24_v1 }
   0x4   :  { %752 = vmatpush3.msra.mxu0 %v29_v3  ;;  %753 = vmatprep.mubr.msk.f32.mxu0 %vm209_vm1, %v25_v7  ;;  %v51_v15 = vsel %vm50_vm0, %v46_v4, 0.0  ;;  %v60_v16 = vsel %vm50_vm0, %v49_v5, 0.0 }
   0x5   :  { %754 = vmatmul.mubr.msk.f32.vlgmr.msra.gmra.mrb[0].mxu0 %vm209_vm1, %v26_v13 }
   0x6   :  { %11 = vsyncpa [#allocation5], 0  ;;  %52 = vadd.xlane.f32.xlu0 %v51_v15  ;;  %61 = vadd.xlane.f32.xlu1 %v60_v16  ;;  %vm82_vm2 = vcmp.eq.s32.totalorder %v78_v10, %v81_v11  ;;  %v79_v18 = vadd.s32 8, %v78_v10  ;;  %v28_v19 = vld [vmem:[%s1131_s2 + $0x18] sm:$0xff]  ;;  %v54_v20 = vsel %vm50_vm0, %v47_v8, 0.0  ;;  %v48_v22 = vunpack.c.l.bf16 %v23_v12  ;;  %p187_p0 = scmp.ne.s32.totalorder %s1129_s0, 0 }
   0x7   :  { %vm975_vm3 = vmpackc.low %vm82_vm2, %vm82_vm2  ;;  %756 = vmatprep.mubr.msk.f32.mxu0 %vm209_vm1, %v27_v14  ;;  %v63_v26 = vadd.f32 %v54_v20, %v51_v15  ;;  %v903_v49 = vmov 0.0   ;;  %v904_v51 = vmov 0   ;;  %vm905_vm14 = vmmov 0  }
   0x8   :  { %v90_v23 = vsel %vm975_vm3, %v21_v0, 0  ;;  %vm83_vm4 = vcmp.eq.s32.totalorder %v79_v18, %v81_v11  ;;  %v92_v24 = vsel %vm975_vm3, %v23_v12, 0  ;;  %v57_v30 = vsel %vm50_vm0, %v48_v22, 0.0  ;;  %759 = vmatprep.subr.bf16.mxu0 %v903_v49  ;;  %859 = vset.pattern.permute.xlu0 %v904_v51  ;;  %s188_s10 = scalar_select %p187_p0, 1, 0 }
   0x9   :  { %v94_v25 = vunpack.c.l.bf16 %v90_v23  ;;  %vm89_vm5 = vmpackc.low %vm83_vm4, %vm83_vm4  ;;  %757 = vmatmul.mubr.msk.f32.gmra.mrb[2].mxu0 %vm209_vm1, %v28_v19  ;;  %v96_v32 = vunpack.c.l.bf16 %v92_v24  ;;  %v70_v33 = vadd.f32 %v60_v16, %v57_v30  ;;  %v64_v36 = vrot.slane %v63_v26, 4  ;;  %860 = vset.pattern.permute.xlu1 %v904_v51 }
   0xa   :  { %55 = vadd.xlane.f32.xlu0 %v54_v20  ;;  %v91_v27 = vsel %vm89_vm5, %v22_v6, 0  ;;  %v93_v28 = vsel %vm89_vm5, %v24_v1, 0  ;;  %s189_s0 = scvt.s32.f32 %s188_s10  ;;  %761 = vmatprep.mubr.msk.bf16.mxu0 %vm905_vm14, %v903_v49 }
   0xb   :  { %v98_v29 = vsel %vm50_vm0, %v94_v25, 0.0  ;;  %v95_v31 = vunpack.c.l.bf16 %v91_v27  ;;  %v97_v35 = vunpack.c.l.bf16 %v93_v28  ;;  %v104_v37 = vsel %vm50_vm0, %v96_v32, 0.0 }
   0xc   :  { %99 = vadd.xlane.f32.xlu1 %v98_v29  ;;  %v71_v38 = vrot.slane %v70_v33, 4  ;;  %v65_v40 = vadd.f32 %v64_v36, %v63_v26  ;;  %v190_v26 = vstv %s189_s0  ;;  %s195_s11 = ssub.f32 1.0, %s189_s0 }
   0xd   :  { %v101_v34 = vsel %vm50_vm0, %v95_v31, 0.0  ;;  %v107_v39 = vsel %vm50_vm0, %v97_v35, 0.0 }
   0xe   :  { %58 = vadd.xlane.f32.xlu0 %v57_v30  ;;  %v72_v41 = vadd.f32 %v71_v38, %v70_v33  ;;  %v66_v42 = vrot.slane %v65_v40, 2  ;;  %v196_v31 = vstv %s195_s11 }
  0x10   :  { %102 = vadd.xlane.f32.xlu1 %v101_v34  ;;  %v73_v43 = vrot.slane %v72_v41, 2  ;;  %v67_v44 = vadd.f32 %v66_v42, %v65_v40 }
  0x12   :  { %105 = vadd.xlane.f32.xlu0 %v104_v37  ;;  %v74_v45 = vadd.f32 %v73_v43, %v72_v41  ;;  %v68_v46 = vrot.slane %v67_v44, 1 }
  0x14   :  { %108 = vadd.xlane.f32.xlu1 %v107_v39  ;;  %v75_v47 = vrot.slane %v74_v45, 1  ;;  %v69_v48 = vadd.f32 %v68_v46, %v67_v44 }
  0x16   :  { %v76_v50 = vadd.f32 %v75_v47, %v74_v45 }
  0x25   :  { %117 = vbcast.lane.b32.xlu1 %v69_v48, 264 }
  0x28   :  { %113 = vbcast.lane.b32.xlu0 %v69_v48, 256 }
  0x29   :  { %120 = vbcast.lane.b32.xlu1 %v76_v50, 256 }
  0x2d   :  { %124 = vbcast.lane.b32.xlu1 %v76_v50, 264 }
  0x93   :  { %v53_v52 = vpop.xlane.xlu0 %52  ;;  %v62_v53 = vpop.xlane.xlu1 %61 }
  0x97   :  { %v56_v54 = vpop.xlane.xlu0 %55 }
  0x99   :  { %v100_v55 = vpop.xlane.xlu1 %99 }
  0x9a   :  { %v146_v63 = vsub.f32 1.0, %v100_v55 }
  0x9b   :  { %v59_v56 = vpop.xlane.xlu0 %58 }
  0x9d   :  { %v103_v57 = vpop.xlane.xlu1 %102 }
  0x9e   :  { %v147_v2 = vsub.f32 1.0, %v103_v57 }
  0x9f   :  { %v106_v58 = vpop.xlane.xlu0 %105 }
  0xa0   :  { %v148_v10 = vsub.f32 1.0, %v106_v58 }
  0xa1   :  { %v109_v59 = vpop.xlane.xlu1 %108 }
  0xa2   :  { %v149_v19 = vsub.f32 1.0, %v109_v59 }
  0xa3   :  { %v114_v60 = vpop.permute.xlu0 %113 }
  0xa4   :  { %v130_v61 = vadd.f32 %v114_v60, %v53_v52 }
  0xa5   :  { %v118_v62 = vpop.permute.xlu1 %117 }
  0xa6   :  { %vm134_vm6 = vcmp.ne.f32.partialorder %v130_v61, 0.0  ;;  %v131_v0 = vadd.f32 %v118_v62, %v56_v54  ;;  %v30_v61 = vld [vmem:[%s1133_s4] sm:$0xff]  ;;  %v31_v62 = vld [vmem:[%s1133_s4 + $0x8] sm:$0xff] }
  0xa7   :  { %v704_v1 = vsel %vm134_vm6, 1.0, %v903_v49 }
  0xa8   :  { %v992_v3 = vmul.f32 %v704_v1, %v146_v63  ;;  %vm135_vm7 = vcmp.ne.f32.partialorder %v131_v0, 0.0  ;;  %v32_v63 = vld [vmem:[%s1133_s4 + $0x10] sm:$0xff]  ;;  %v821_v1 = vpack.c.bf16 %v31_v62, %v30_v61 }
  0xa9   :  { %v705_v4 = vsel %vm135_vm7, 1.0, %v903_v49  ;;  %v121_v5 = vpop.permute.xlu1 %120 }
  0xaa   :  { %v154_v6 = vadd.f32 %v992_v3, %v53_v52  ;;  %v996_v7 = vmul.f32 %v705_v4, %v147_v2  ;;  %v132_v8 = vadd.f32 %v121_v5, %v59_v56  ;;  %v33_v2 = vld [vmem:[%s1133_s4 + $0x18] sm:$0xff]  ;;  %v34_v5 = vld [vmem:[%s1133_s4 + $0x20] sm:$0xff]  ;;  %822 = vmatprep.subr.bf16.mxu1 %v821_v1 }
  0xab   :  { %v825_v4 = vpack.c.bf16 %v33_v2, %v32_v63  ;;  %824 = vmatpush3.bf16.msra.mxu1 %v821_v1 }
  0xac   :  { %vm158_vm8 = vcmp.ne.f32.partialorder %v154_v6, 0.0  ;;  %v155_v11 = vadd.f32 %v996_v7, %v56_v54  ;;  %vm136_vm9 = vcmp.ne.f32.partialorder %v132_v8, 0.0 }
  0xad   :  { %v162_v12 = vsel %vm158_vm8, %v154_v6, 1.0  ;;  %v706_v13 = vsel %vm136_vm9, 1.0, %v903_v49  ;;  %v125_v14 = vpop.permute.xlu1 %124  ;;  %v35_v6 = vld [vmem:[%s1133_s4 + $0x28] sm:$0xff]  ;;  %826 = vmatprep.subr.bf16.mxu1 %v825_v4 }
  0xae   :  { %863 = vrsqrt.f32 %v162_v12  ;;  %vm159_vm10 = vcmp.ne.f32.partialorder %v155_v11, 0.0  ;;  %v1004_v15 = vmul.f32 %v706_v13, %v148_v10  ;;  %v133_v16 = vadd.f32 %v125_v14, %v62_v53  ;;  %v38_v14 = vld [vmem:[%s1133_s4 + $0x40] sm:$0xff] }
  0xaf   :  { %v163_v18 = vsel %vm159_vm10, %v155_v11, 1.0  ;;  %v829_v8 = vpack.c.bf16 %v35_v6, %v34_v5  ;;  %v36_v11 = vld [vmem:[%s1133_s4 + $0x30] sm:$0xff]  ;;  %828 = vmatpush3.bf16.msra.mxu1 %v825_v4 }
  0xb0   :  { %865 = vrsqrt.f32 %v163_v18  ;;  %v156_v20 = vadd.f32 %v1004_v15, %v59_v56  ;;  %vm137_vm11 = vcmp.ne.f32.partialorder %v133_v16, 0.0 }
  0xb1   :  { %v707_v21 = vsel %vm137_vm11, 1.0, %v903_v49  ;;  %830 = vmatprep.subr.bf16.mxu1 %v829_v8 }
  0xb2   :  { %vm160_vm12 = vcmp.ne.f32.partialorder %v156_v20, 0.0  ;;  %v153_v22 = vmul.f32 %v707_v21, %v149_v19  ;;  %v41_v19 = vld [vmem:[%s1133_s4 + $0x58] sm:$0xff]  ;;  %v42_v21 = vld [vmem:[%s1133_s4 + $0x60] sm:$0xff] }
  0xb3   :  { %v164_v23 = vsel %vm160_vm12, %v156_v20, 1.0  ;;  %832 = vmatpush3.bf16.msra.mxu1 %v829_v8 }
  0xb4   :  { %867 = vrsqrt.f32 %v164_v23  ;;  %v157_v24 = vadd.f32 %v153_v22, %v62_v53 }
  0xb5   :  { %869 = vrcp.f32 %v162_v12  ;;  %v37_v12 = vld [vmem:[%s1133_s4 + $0x38] sm:$0xff] }
  0xb6   :  { %vm161_vm13 = vcmp.ne.f32.partialorder %v157_v24, 0.0  ;;  %v833_v13 = vpack.c.bf16 %v37_v12, %v36_v11 }
  0xb7   :  { %v165_v25 = vsel %vm161_vm13, %v157_v24, 1.0 }
  0xb8   :  { %v864_v27 = vpop.eup %863  ;;  %871 = vrsqrt.f32 %v165_v25  ;;  %834 = vmatprep.subr.bf16.mxu1 %v833_v13 }
  0xb9   :  { %v170_v28 = vsel %vm158_vm8, %v864_v27, 0.0  ;;  %873 = vrcp.f32 %v163_v18  ;;  %v40_v18 = vld [vmem:[%s1133_s4 + $0x50] sm:$0xff]  ;;  %836 = vmatpush3.bf16.msra.mxu1 %v833_v13 }
  0xba   :  { %v866_v29 = vpop.eup %865  ;;  %v191_v30 = vmul.f32 %v190_v26, %v170_v28  ;;  %875 = vrcp.f32 %v164_v23  ;;  %v841_v20 = vpack.c.bf16 %v41_v19, %v40_v18 }
  0xbb   :  { %v171_v32 = vsel %vm159_vm10, %v866_v29, 0.0  ;;  %877 = vrcp.f32 %v165_v25 }
  0xbc   :  { %v205_v33 = vadd.f32 %v196_v31, %v191_v30  ;;  %v192_v34 = vmul.f32 %v190_v26, %v171_v32 }
  0xbe   :  { %v868_v35 = vpop.eup %867  ;;  %321 = vperm.xlu0 %859, %v205_v33   ;;  %v206_v36 = vadd.f32 %v196_v31, %v192_v34 }
  0xbf   :  { %v172_v37 = vsel %vm160_vm12, %v868_v35, 0.0  ;;  %v870_v38 = vpop.eup %869 }
  0xc0   :  { %326 = vperm.xlu1 %860, %v206_v36   ;;  %v193_v39 = vmul.f32 %v190_v26, %v172_v37  ;;  %v182_v43 = vsel %vm158_vm8, %v870_v38, 0.0 }
  0xc1   :  { %v197_v47 = vmul.f32 %v196_v31, %v182_v43  ;;  %v45_v43 = vld [vmem:[%s1133_s4 + $0x78] sm:$0xff] }
  0xc2   :  { %v872_v40 = vpop.eup %871  ;;  %v207_v41 = vadd.f32 %v196_v31, %v193_v39 }
  0xc3   :  { %v173_v42 = vsel %vm161_vm13, %v872_v40, 0.0  ;;  %v874_v44 = vpop.eup %873  ;;  %v201_v51 = vadd.f32 %v197_v47, %v191_v30 }
  0xc4   :  { %331 = vperm.xlu1 %860, %v207_v41   ;;  %v194_v45 = vmul.f32 %v190_v26, %v173_v42  ;;  %v183_v48 = vsel %vm159_vm10, %v874_v44, 0.0  ;;  %v876_v50 = vpop.eup %875  ;;  %v44_v42 = vld [vmem:[%s1133_s4 + $0x70] sm:$0xff] }
  0xc5   :  { %v198_v52 = vmul.f32 %v196_v31, %v183_v48  ;;  %v184_v53 = vsel %vm160_vm12, %v876_v50, 0.0  ;;  %v878_v54 = vpop.eup %877  ;;  %v849_v44 = vpack.c.bf16 %v45_v43, %v44_v42 }
  0xc6   :  { %v208_v46 = vadd.f32 %v196_v31, %v194_v45  ;;  %v199_v56 = vmul.f32 %v196_v31, %v184_v53  ;;  %v185_v57 = vsel %vm161_vm13, %v878_v54, 0.0 }
  0xc7   :  { %v202_v55 = vadd.f32 %v198_v52, %v192_v34  ;;  %v200_v59 = vmul.f32 %v196_v31, %v185_v57 }
  0xc8   :  { %347 = vperm.xlu1 %860, %v992_v3   ;;  %336 = vperm.xlu0 %859, %v208_v46   ;;  %v203_v58 = vadd.f32 %v199_v56, %v193_v39 }
  0xc9   :  { %v204_v60 = vadd.f32 %v200_v59, %v194_v45 }
  0xcc   :  { %352 = vperm.xlu0 %859, %v996_v7   ;;  %469 = vperm.xlu1 %860, %v201_v51  }
  0xd0   :  { %474 = vperm.xlu0 %859, %v202_v55   ;;  %357 = vperm.xlu1 %860, %v1004_v15   ;;  %v39_v15 = vld [vmem:[%s1133_s4 + $0x48] sm:$0xff] }
  0xd1   :  { %v837_v16 = vpack.c.bf16 %v39_v15, %v38_v14 }
  0xd3   :  { %838 = vmatprep.subr.bf16.mxu1 %v837_v16 }
  0xd4   :  { %362 = vperm.xlu0 %859, %v153_v22   ;;  %479 = vperm.xlu1 %860, %v203_v58   ;;  %v43_v22 = vld [vmem:[%s1133_s4 + $0x68] sm:$0xff]  ;;  %s906_s4 = smov [#allocation4]  }
  0xd5   :  { %840 = vmatpush3.bf16.msra.mxu1 %v837_v16  ;;  %v845_v23 = vpack.c.bf16 %v43_v22, %v42_v21  ;;  %s693_s15 = sshll.u32 %s906_s4, 4  ;;  %s694_s15 = int_to_ptr.vmem [resolvable:$true] %s693_s15 }
  0xd6   :  { %842 = vmatprep.subr.bf16.mxu1 %v841_v20  ;;  %s879_s16 = scalar_lea.vmem %s694_s15, 512  ;;  %p884_p2 = scmp.lt.s32.totalorder %s694_s15, %s694_s15 }
  0xd7   :  { %p880_p1 = scmp.ne.s32.totalorder %s694_s15, %s879_s16  ;;  %p885_p3 = scmp.lt.s32.totalorder %s879_s16, %s879_s16 }
  0xd8   :  { %484 = vperm.xlu0 %859, %v204_v60   ;;  %v755_v0 = vpop.f32.mrb[0].mxu0 }
  0xd9   :  { %v288_v3 = vpop.f32.mrb[1].mxu0  ;;  %844 = vmatpush3.bf16.msra.mxu1 %v841_v20  ;;  %v312_v25 = vmul.f32 0.01, %v755_v0  ;;  %vm308_vm1 = vcmp.ge.f32.partialorder %v755_v0, 0.0  ;;  %p886_p4 = por %p885_p3, %p884_p2 }
  0xda   :  { %846 = vmatprep.subr.bf16.mxu1 %v845_v23  ;;  %v311_v24 = vmul.f32 0.01, %v288_v3  ;;  %vm307_vm15 = vcmp.ge.f32.partialorder %v288_v3, 0.0 }
  0xdb   :  { %v316_v28 = vsel %vm308_vm1, %v755_v0, %v312_v25  ;;  %p887_p5 = pnand %p886_p4, %p880_p1 }
  0xdc   :  { %v758_v7 = vpop.f32.mrb[2].mxu0  ;;  %v315_v26 = vsel %vm307_vm15, %v288_v3, %v311_v24 }
  0xdd   :  { %v298_v10 = vpop.f32.mrb[3].mxu0  ;;  %848 = vmatpush3.bf16.msra.mxu1 %v845_v23  ;;  %v314_v34 = vmul.f32 0.01, %v758_v7  ;;  %vm310_vm3 = vcmp.ge.f32.partialorder %v758_v7, 0.0 }
  0xde   :  { %v313_v32 = vmul.f32 0.01, %v298_v10  ;;  %vm309_vm2 = vcmp.ge.f32.partialorder %v298_v10, 0.0  ;;  %850 = vmatprep.subr.bf16.mxu1 %v849_v44 }
  0xdf   :  { %v318_v37 = vsel %vm310_vm3, %v758_v7, %v314_v34 }
  0xe0   :  { %v317_v35 = vsel %vm309_vm2, %v298_v10, %v313_v32 }
  0xe1   :  { %852 = vmatpush3.bf16.msra.mxu1 %v849_v44 }
 0x13d   :  { %v1066_v27 = vpop.permute.xlu0 %321 }
 0x13e   :  { %v339_v30 = vmul.f32 %v1066_v27, %v315_v26 }
 0x13f   :  { %v1068_v29 = vpop.permute.xlu1 %326 }
 0x140   :  { %v340_v31 = vmul.f32 %v1068_v29, %v316_v28 }
 0x142   :  { %v343_v33 = vpack.c.bf16 %v340_v31, %v339_v30 }
 0x143   :  { %v1072_v36 = vpop.permute.xlu1 %331 }
 0x144   :  { %760 = vmatpush3.bf16.msra.mxu0 %v343_v33  ;;  %v341_v39 = vmul.f32 %v1072_v36, %v317_v35 }
 0x145   :  { %765 = vmatprep.subr.bf16.mxu0 %v903_v49 }
 0x147   :  { %762 = vmatmul.mubr.msk.bf16.vlgmr.msra.gmra.mrb[4].mxu0 %vm50_vm0, %v954_v9  ;;  %v1077_v38 = vpop.permute.xlu0 %336  ;;  %v348_v45 = vpop.permute.xlu1 %347 }
 0x148   :  { %v342_v40 = vmul.f32 %v1077_v38, %v318_v37  ;;  %767 = vmatprep.mubr.msk.bf16.mxu0 %vm905_vm14, %v903_v49  ;;  %v365_v48 = vmul.f32 %v348_v45, %v339_v30 }
 0x14a   :  { %v344_v41 = vpack.c.bf16 %v342_v40, %v341_v39 }
 0x14b   :  { %v1094_v46 = vpop.permute.xlu0 %352  ;;  %v1096_v47 = vpop.permute.xlu1 %469 }
 0x14c   :  { %766 = vmatpush3.bf16.msra.mxu0 %v344_v41  ;;  %v366_v52 = vmul.f32 %v1094_v46, %v340_v31 }
 0x14d   :  { %809 = vmatprep.subr.bf16.mxu0 %v903_v49 }
 0x14f   :  { %768 = vmatmul.mubr.msk.bf16.vlgmr.msra.gmra.mrb[8].mxu0 %vm50_vm0, %v968_v17  ;;  %v1098_v50 = vpop.permute.xlu0 %474  ;;  %v358_v59 = vpop.permute.xlu1 %357 }
 0x150   :  { %811 = vmatprep.mubr.msk.bf16.mxu0 %vm905_vm14, %v903_v49  ;;  %v367_v62 = vmul.f32 %v358_v59, %v341_v39 }
 0x153   :  { %v363_v61 = vpop.permute.xlu0 %362  ;;  %v480_v3 = vpop.permute.xlu1 %479 }
 0x154   :  { %v368_v0 = vmul.f32 %v363_v61, %v342_v40 }
 0x157   :  { %v485_v8 = vpop.permute.xlu0 %484 }
 0x21a   :  { %v411_v51 = vpop.f32.mrb[4].mxu0 }
 0x21b   :  { %v412_v53 = vadd.f32 %v411_v51, %v365_v48  ;;  %v763_v54 = vpop.f32.mrb[5].mxu0 }
 0x21c   :  { %v414_v55 = vpop.f32.mrb[6].mxu0 }
 0x21d   :  { %v415_v56 = vadd.f32 %v414_v55, %v366_v52  ;;  %v764_v57 = vpop.f32.mrb[7].mxu0  ;;  %v487_v58 = vmul.f32 %v1096_v47, %v412_v53 }
 0x21f   :  { %v488_v60 = vmul.f32 %v1098_v50, %v415_v56  ;;  %803 = vmatprep.mubr.f32.mxu1 %v487_v58 }
 0x221   :  { %804 = vmatmul.mubr.f32.vlgmr.msra.gmra.mrb[0].mxu1 %v488_v60 }
 0x222   :  { %v460_v63 = vpop.f32.mrb[8].mxu0 }
 0x223   :  { %v461_v1 = vadd.f32 %v460_v63, %v367_v62  ;;  %v769_v2 = vpop.f32.mrb[9].mxu0 }
 0x224   :  { %v463_v4 = vpop.f32.mrb[10].mxu0 }
 0x225   :  { %v489_v5 = vmul.f32 %v480_v3, %v461_v1  ;;  %v464_v6 = vadd.f32 %v463_v4, %v368_v0  ;;  %v770_v7 = vpop.f32.mrb[11].mxu0 }
 0x227   :  { %v490_v10 = vmul.f32 %v485_v8, %v464_v6  ;;  %806 = vmatprep.mubr.f32.mxu1 %v489_v5 }
 0x229   :  { %807 = vmatmul.mubr.f32.gmra.mrb[2].mxu1 %v490_v10 }
 0x2f4   :  { %v805_v11 = vpop.f32.mrb[0].mxu1 }
 0x2f5   :  { %vm577_vm4 = vcmp.ge.f32.partialorder %v805_v11, 0.0  ;;  %v581_v12 = vmul.f32 0.01, %v805_v11  ;;  %v557_v13 = vpop.f32.mrb[1].mxu1 }
 0x2f6   :  { %vm576_vm5 = vcmp.ge.f32.partialorder %v557_v13, 0.0  ;;  %v580_v14 = vmul.f32 0.01, %v557_v13 }
 0x2f7   :  { %v585_v15 = vsel %vm577_vm4, %v805_v11, %v581_v12 }
 0x2f8   :  { %v589_v16 = vmul.f32 %v585_v15, %v1068_v29  ;;  %v584_v18 = vsel %vm576_vm5, %v557_v13, %v580_v14 }
 0x2f9   :  { %v588_v19 = vmul.f32 %v584_v18, %v1066_v27 }
 0x2fa   :  { %v595_v34 = vmul.f32 %v589_v16, %v1094_v46 }
 0x2fb   :  { %v592_v20 = vpack.c.bf16 %v589_v16, %v588_v19  ;;  %v594_v30 = vmul.f32 %v588_v19, %v348_v45 }
 0x2fc   :  { %v808_v21 = vpop.f32.mrb[2].mxu1 }
 0x2fd   :  { %vm579_vm6 = vcmp.ge.f32.partialorder %v808_v21, 0.0  ;;  %v583_v22 = vmul.f32 0.01, %v808_v21  ;;  %v567_v23 = vpop.f32.mrb[3].mxu1  ;;  %810 = vmatpush3.bf16.msra.mxu0 %v592_v20 }
 0x2fe   :  { %vm578_vm7 = vcmp.ge.f32.partialorder %v567_v23, 0.0  ;;  %v582_v24 = vmul.f32 0.01, %v567_v23  ;;  %815 = vmatprep.subr.bf16.mxu0 %v903_v49 }
 0x2ff   :  { %v587_v25 = vsel %vm579_vm6, %v808_v21, %v583_v22 }
 0x300   :  { %v591_v26 = vmul.f32 %v587_v25, %v1077_v38  ;;  %v586_v28 = vsel %vm578_vm7, %v567_v23, %v582_v24  ;;  %812 = vmatmul.mubr.msk.bf16.vlgmr.msra.gmra.mrb[12].mxu0 %vm50_vm0, %v954_v9 }
 0x301   :  { %v590_v29 = vmul.f32 %v586_v28, %v1072_v36  ;;  %817 = vmatprep.mubr.msk.bf16.mxu0 %vm905_vm14, %v903_v49 }
 0x303   :  { %v593_v27 = vpack.c.bf16 %v591_v26, %v590_v29  ;;  %v596_v49 = vmul.f32 %v590_v29, %v358_v59 }
 0x305   :  { %816 = vmatpush3.bf16.msra.mxu0 %v593_v27 }
 0x308   :  { %818 = vmatmul.mubr.msk.bf16.vlgmr.msra.gmra.mrb[16].mxu0 %vm50_vm0, %v968_v17  ;;  %v597_v17 = vmul.f32 %v591_v26, %v363_v61 }
 0x3d3   :  { %v632_v31 = vpop.f32.mrb[12].mxu0 }
 0x3d4   :  { %v633_v32 = vadd.f32 %v632_v31, %v594_v30  ;;  %v813_v33 = vpop.f32.mrb[13].mxu0 }
 0x3d5   :  { %v635_v35 = vpop.f32.mrb[14].mxu0 }
 0x3d6   :  { %v680_v37 = vmul.f32 %v633_v32, %v1096_v47  ;;  %v636_v9 = vadd.f32 %v635_v35, %v595_v34  ;;  %v814_v38 = vpop.f32.mrb[15].mxu0 }
 0x3d8   :  { %684 = vst [vmem:[#allocation4] sm:$0xff] %v680_v37  ;;  %v681_v36 = vmul.f32 %v636_v9, %v1098_v50 }
 0x3da   :  { %685 = vst [vmem:[#allocation4 + $0x8] sm:$0xff] %v681_v36 }
 0x3db   :  { %v673_v39 = vpop.f32.mrb[16].mxu0 }
 0x3dc   :  { %v674_v40 = vadd.f32 %v673_v39, %v596_v49  ;;  %v819_v41 = vpop.f32.mrb[17].mxu0 }
 0x3dd   :  { %v676_v42 = vpop.f32.mrb[18].mxu0 }
 0x3de   :  { %v682_v43 = vmul.f32 %v674_v40, %v480_v3  ;;  %v677_v44 = vadd.f32 %v676_v42, %v597_v17  ;;  %v820_v45 = vpop.f32.mrb[19].mxu0 }
 0x3e0   :  { %686 = vst [vmem:[#allocation4 + $0x10] sm:$0xff] %v682_v43  ;;  %v683_v46 = vmul.f32 %v677_v44, %v485_v8 }
 0x3e2   :  { %687 = vst [vmem:[#allocation4 + $0x18] sm:$0xff] %v683_v46 }
 0x3e3   :  { %890 = shalt.err (!%p887_p5)
}
 0x3e4   :  { %s891_s19 = scalar_lea.hbm %s1134_s5, 512 }
 0x3e5   :  { %p892_p6 = scmp.ne.s32.totalorder %s1134_s5, %s891_s19  ;;  %p895_p7 = scmp.lt.u32.totalorder %s891_s19, %s1134_s5 }
 0x3e7   :  { %p897_p8 = pnand %p895_p7, %p892_p6 }
 0x3e9   :  { %900 = shalt.err (!%p897_p8)
}
 0x3ea   :  { %s907_s24 = smov 128   ;;  %s908_s25 = smov 8  }
 0x3eb   :  { %699 = dma.vmem_to_hbm [thread:$0]  %s694_s15, 512, %s1134_s5, [#allocation5], %s907_s24, %s907_s24, %s908_s25  }
 0x3ec   :  { %901 = dma.done.wait [#allocation5], 512  }
 0x3ed   :  { %902 = vsyncadd [#allocation5], 4294966784 }
 0x3ee   :  { %703 = vsyncpa [#allocation5], 1 }

</bundles_post_ra>
